<compile_context>
chip_gen: v7x
topology: tpu7x:2x2x1
jax: 0.10.0
libtpu: 0.0.40
codegen_flags: <defaults>
</compile_context>

<pallas_src>
import functools

import jax
import jax.numpy as jnp
from jax.experimental import pallas as pl
from jax.experimental.pallas import tpu as pltpu


def _round_up(x, m):
    return ((x + m - 1) // m) * m


def mlp_kernel(x_ref, w1_ref, b1_ref, w2_ref, b2_ref, w3_ref, b3_ref, o_ref):
    # fc1 + relu : bf16 operands on the MXU, f32 accumulate, f32 elementwise.
    h1 = jnp.dot(x_ref[...], w1_ref[...], preferred_element_type=jnp.float32)
    h1 = jnp.maximum(h1 + b1_ref[...], 0.0)
    # fc2 + relu (hidden padded to 128 lanes -> whole 8x128 vregs everywhere).
    h2 = jnp.dot(h1.astype(jnp.bfloat16), w2_ref[...],
                 preferred_element_type=jnp.float32)
    h2 = jnp.maximum(h2 + b2_ref[...], 0.0)
    # fc3 (no activation), output padded to 128 lanes -> unmasked dense stores.
    out = jnp.dot(h2.astype(jnp.bfloat16), w3_ref[...],
                  preferred_element_type=jnp.float32)
    o_ref[...] = (out + b3_ref[...]).astype(o_ref.dtype)


@functools.partial(jax.jit, static_argnames=("block_b",))
def simple_nn_forward(x, w1, b1, w2, b2, w3, b3, *, block_b=512):
    B, d_in = x.shape
    assert d_in == 28 * 28
    # Lane-dense padded dims.
    DIN_P, H1, H2_P, DOUT_P = 896, 128, 128, 128

    # Zero-pad features / hidden / output to multiples of 128 (exact in bf16, so
    # results are unchanged).
    x_p = jnp.pad(x, ((0, 0), (0, DIN_P - d_in)))
    w1_p = jnp.pad(w1, ((0, DIN_P - w1.shape[0]), (0, 0)))                       # (896,128)
    w2_p = jnp.pad(w2, ((0, 0), (0, H2_P - w2.shape[1])))                        # (128,128)
    b2_p = jnp.pad(b2, ((0, 0), (0, H2_P - b2.shape[1])))                        # (1,128)
    w3_p = jnp.pad(w3, ((0, H2_P - w3.shape[0]), (0, DOUT_P - w3.shape[1])))     # (128,128)
    b3_p = jnp.pad(b3, ((0, 0), (0, DOUT_P - b3.shape[1])))                      # (1,128)

    # Batch tile: multiple of 16 (bf16 sublane packing); capped so double-buffered
    # activations comfortably fit the 64 MiB v7x VMEM (tile 512 -> < 3 MiB total).
    tb = min(block_b, _round_up(B, 16))
    B_pad = _round_up(B, tb)
    if B_pad != B:
        x_p = jnp.pad(x_p, ((0, B_pad - B), (0, 0)))

    # bf16 matmul operands at the call boundary (halves HBM traffic); biases f32.
    x_bf = x_p.astype(jnp.bfloat16)
    w1_bf = w1_p.astype(jnp.bfloat16)
    w2_bf = w2_p.astype(jnp.bfloat16)
    w3_bf = w3_p.astype(jnp.bfloat16)
    b1_f = b1.astype(jnp.float32)
    b2_f = b2_p.astype(jnp.float32)
    b3_f = b3_p.astype(jnp.float32)

    resident = lambda shape: pl.BlockSpec(shape, lambda i: (0, 0))

    out = pl.pallas_call(
        mlp_kernel,
        out_shape=jax.ShapeDtypeStruct((B_pad, DOUT_P), jnp.float32),
        grid=(B_pad // tb,),
        in_specs=[
            pl.BlockSpec((tb, DIN_P), lambda i: (i, 0)),   # x: batch-tiled, pipelined
            resident((DIN_P, H1)),                         # w1 resident across grid
            resident((1, H1)),                             # b1
            resident((H1, H2_P)),                          # w2
            resident((1, H2_P)),                           # b2
            resident((H2_P, DOUT_P)),                      # w3
            resident((1, DOUT_P)),                         # b3
        ],
        out_specs=pl.BlockSpec((tb, DOUT_P), lambda i: (i, 0)),
        compiler_params=pltpu.CompilerParams(
            dimension_semantics=("parallel",)),            # shard batch over TCs (v7x)
    )(x_bf, w1_bf, b1_f, w2_bf, b2_f, w3_bf, b3_f)

    # Strip batch padding and the 118 zero output columns.
    return out[:B, :10]


def init_params(key):
    # Deterministic init mimicking nn.Linear's uniform(-1/sqrt(fan_in), 1/sqrt(fan_in)).
    dims = [(28 * 28, 128), (128, 64), (64, 10)]
    params = []
    for i, (fan_in, fan_out) in enumerate(dims):
        kw, kb = jax.random.split(jax.random.fold_in(key, i))
        bound = 1.0 / jnp.sqrt(jnp.float32(fan_in))
        # Stored as (in, out) == PyTorch weight.T
        w = jax.random.uniform(kw, (fan_in, fan_out), jnp.float32, -bound, bound)
        b = jax.random.uniform(kb, (1, fan_out), jnp.float32, -bound, bound)
        params += [w, b]
    return params


if __name__ == "__main__":
    key = jax.random.PRNGKey(0)
    kx, kp = jax.random.split(key)

    B = 32
    x = jax.random.normal(kx, (B, 28 * 28), jnp.float32)
    w1, b1, w2, b2, w3, b3 = init_params(kp)

    out = simple_nn_forward(x, w1, b1, w2, b2, w3, b3)
    out = jax.block_until_ready(out)
    assert out.shape == (B, 10)

    # Pure-JAX reference with matching bf16-operand / f32-accumulate semantics.
    bf = jnp.bfloat16
    r1 = jnp.maximum(jnp.dot(x.astype(bf), w1.astype(bf),
                             preferred_element_type=jnp.float32) + b1, 0.0)
    r2 = jnp.maximum(jnp.dot(r1.astype(bf), w2.astype(bf),
                             preferred_element_type=jnp.float32) + b2, 0.0)
    ref = jnp.dot(r2.astype(bf), w3.astype(bf),
                  preferred_element_type=jnp.float32) + b3
    assert jnp.allclose(out, ref, atol=1e-2, rtol=1e-2), (
        float(jnp.max(jnp.abs(out - ref))))

    # Loose sanity check against the full-f32 math as well.
    f1 = jnp.maximum(x @ w1 + b1, 0.0)
    f2 = jnp.maximum(f1 @ w2 + b2, 0.0)
    f32_ref = f2 @ w3 + b3
    assert jnp.max(jnp.abs(out - f32_ref)) < 0.1

    print("KERNEL_OK")
</pallas_src>

<mosaic_0001>
module attributes {stable_mosaic.version = 11 : i64} {
  func.func @mlp_kernel(%arg0: i32, %arg1: memref<32x896xbf16, #tpu.memory_space<vmem>>, %arg2: memref<896x128xbf16, #tpu.memory_space<vmem>>, %arg3: memref<1x128xf32, #tpu.memory_space<vmem>>, %arg4: memref<128x128xbf16, #tpu.memory_space<vmem>>, %arg5: memref<1x128xf32, #tpu.memory_space<vmem>>, %arg6: memref<128x128xbf16, #tpu.memory_space<vmem>>, %arg7: memref<1x128xf32, #tpu.memory_space<vmem>>, %arg8: memref<32x128xf32, #tpu.memory_space<vmem>>) attributes {dimension_semantics = [#tpu.dimension_semantics<parallel>], iteration_bounds = array<i64: 1>, scalar_prefetch = 0 : i64, scratch_operands = 0 : i64, tpu.core_type = #tpu.core_type<tc>, window_params = [{transform_indices = @transform_0, window_bounds = array<i64: 32, 896>}, {pipeline_mode = #tpu.pipeline_mode<synchronous>, transform_indices = @transform_1, window_bounds = array<i64: 896, 128>}, {pipeline_mode = #tpu.pipeline_mode<synchronous>, transform_indices = @transform_2, window_bounds = array<i64: 1, 128>}, {pipeline_mode = #tpu.pipeline_mode<synchronous>, transform_indices = @transform_3, window_bounds = array<i64: 128, 128>}, {pipeline_mode = #tpu.pipeline_mode<synchronous>, transform_indices = @transform_4, window_bounds = array<i64: 1, 128>}, {pipeline_mode = #tpu.pipeline_mode<synchronous>, transform_indices = @transform_5, window_bounds = array<i64: 128, 128>}, {pipeline_mode = #tpu.pipeline_mode<synchronous>, transform_indices = @transform_6, window_bounds = array<i64: 1, 128>}, {transform_indices = @transform_7, window_bounds = array<i64: 32, 128>}]} {
    %c0 = arith.constant 0 : index
    %c0_0 = arith.constant 0 : index
    %0 = vector.load %arg1[%c0, %c0_0] : memref<32x896xbf16, #tpu.memory_space<vmem>>, vector<32x896xbf16>
    %c0_1 = arith.constant 0 : index
    %c0_2 = arith.constant 0 : index
    %1 = vector.load %arg2[%c0_1, %c0_2] : memref<896x128xbf16, #tpu.memory_space<vmem>>, vector<896x128xbf16>
    %cst = arith.constant dense<0.000000e+00> : vector<32x128xf32>
    %2 = tpu.matmul %0, %1, %cst {dimension_numbers = #tpu.dot_dimension_numbers<[1], [0], [0], [1], [0, 0, 1, 1], [], []>} : vector<32x896xbf16>, vector<896x128xbf16>, vector<32x128xf32> -> vector<32x128xf32>
    %c0_3 = arith.constant 0 : index
    %c0_4 = arith.constant 0 : index
    %3 = vector.load %arg3[%c0_3, %c0_4] : memref<1x128xf32, #tpu.memory_space<vmem>>, vector<1x128xf32>
    %4 = vector.broadcast %3 : vector<1x128xf32> to vector<32x128xf32>
    %5 = arith.addf %2, %4 : vector<32x128xf32>
    %cst_5 = arith.constant 0.000000e+00 : f32
    %6 = vector.broadcast %cst_5 : f32 to vector<32x128xf32>
    %7 = arith.maximumf %5, %6 : vector<32x128xf32>
    %8 = arith.truncf %7 : vector<32x128xf32> to vector<32x128xbf16>
    %c0_6 = arith.constant 0 : index
    %c0_7 = arith.constant 0 : index
    %9 = vector.load %arg4[%c0_6, %c0_7] : memref<128x128xbf16, #tpu.memory_space<vmem>>, vector<128x128xbf16>
    %cst_8 = arith.constant dense<0.000000e+00> : vector<32x128xf32>
    %10 = tpu.matmul %8, %9, %cst_8 {dimension_numbers = #tpu.dot_dimension_numbers<[1], [0], [0], [1], [0, 0, 1, 1], [], []>} : vector<32x128xbf16>, vector<128x128xbf16>, vector<32x128xf32> -> vector<32x128xf32>
    %c0_9 = arith.constant 0 : index
    %c0_10 = arith.constant 0 : index
    %11 = vector.load %arg5[%c0_9, %c0_10] : memref<1x128xf32, #tpu.memory_space<vmem>>, vector<1x128xf32>
    %12 = vector.broadcast %11 : vector<1x128xf32> to vector<32x128xf32>
    %13 = arith.addf %10, %12 : vector<32x128xf32>
    %cst_11 = arith.constant 0.000000e+00 : f32
    %14 = vector.broadcast %cst_11 : f32 to vector<32x128xf32>
    %15 = arith.maximumf %13, %14 : vector<32x128xf32>
    %16 = arith.truncf %15 : vector<32x128xf32> to vector<32x128xbf16>
    %c0_12 = arith.constant 0 : index
    %c0_13 = arith.constant 0 : index
    %17 = vector.load %arg6[%c0_12, %c0_13] : memref<128x128xbf16, #tpu.memory_space<vmem>>, vector<128x128xbf16>
    %cst_14 = arith.constant dense<0.000000e+00> : vector<32x128xf32>
    %18 = tpu.matmul %16, %17, %cst_14 {dimension_numbers = #tpu.dot_dimension_numbers<[1], [0], [0], [1], [0, 0, 1, 1], [], []>} : vector<32x128xbf16>, vector<128x128xbf16>, vector<32x128xf32> -> vector<32x128xf32>
    %c0_15 = arith.constant 0 : index
    %c0_16 = arith.constant 0 : index
    %19 = vector.load %arg7[%c0_15, %c0_16] : memref<1x128xf32, #tpu.memory_space<vmem>>, vector<1x128xf32>
    %20 = vector.broadcast %19 : vector<1x128xf32> to vector<32x128xf32>
    %21 = arith.addf %18, %20 : vector<32x128xf32>
    %c0_17 = arith.constant 0 : index
    %c0_18 = arith.constant 0 : index
    %22 = vector.load %arg8[%c0_17, %c0_18] : memref<32x128xf32, #tpu.memory_space<vmem>>, vector<32x128xf32>
    tpu.vector_store %arg8[%c0_17, %c0_18], %21 {strides = array<i32>} : memref<32x128xf32, #tpu.memory_space<vmem>>, vector<32x128xf32>,
    return
  }
  func.func @transform_0(%arg0: i32) -> (i32, i32) {
    %c0_i32 = arith.constant 0 : i32
    %c0_i32_0 = arith.constant 0 : i32
    return %arg0, %c0_i32 : i32, i32
  }
  func.func @transform_1(%arg0: i32) -> (i32, i32) {
    %c0_i32 = arith.constant 0 : i32
    %c0_i32_0 = arith.constant 0 : i32
    %c0_i32_1 = arith.constant 0 : i32
    return %c0_i32, %c0_i32_0 : i32, i32
  }
  func.func @transform_2(%arg0: i32) -> (i32, i32) {
    %c0_i32 = arith.constant 0 : i32
    %c0_i32_0 = arith.constant 0 : i32
    %c0_i32_1 = arith.constant 0 : i32
    return %c0_i32, %c0_i32_0 : i32, i32
  }
  func.func @transform_3(%arg0: i32) -> (i32, i32) {
    %c0_i32 = arith.constant 0 : i32
    %c0_i32_0 = arith.constant 0 : i32
    %c0_i32_1 = arith.constant 0 : i32
    return %c0_i32, %c0_i32_0 : i32, i32
  }
  func.func @transform_4(%arg0: i32) -> (i32, i32) {
    %c0_i32 = arith.constant 0 : i32
    %c0_i32_0 = arith.constant 0 : i32
    %c0_i32_1 = arith.constant 0 : i32
    return %c0_i32, %c0_i32_0 : i32, i32
  }
  func.func @transform_5(%arg0: i32) -> (i32, i32) {
    %c0_i32 = arith.constant 0 : i32
    %c0_i32_0 = arith.constant 0 : i32
    %c0_i32_1 = arith.constant 0 : i32
    return %c0_i32, %c0_i32_0 : i32, i32
  }
  func.func @transform_6(%arg0: i32) -> (i32, i32) {
    %c0_i32 = arith.constant 0 : i32
    %c0_i32_0 = arith.constant 0 : i32
    %c0_i32_1 = arith.constant 0 : i32
    return %c0_i32, %c0_i32_0 : i32, i32
  }
  func.func @transform_7(%arg0: i32) -> (i32, i32) {
    %c0_i32 = arith.constant 0 : i32
    %c0_i32_0 = arith.constant 0 : i32
    return %arg0, %c0_i32 : i32, i32
  }
}

</mosaic_0001>

<bundles_post_ra>
// kernel: simple_nn_forward.1
= control target key start
LH: loop header
LB: loop body
LE: loop exit
PB: predicated region body
PF: predicated region fallthrough
CT: control target
= control target key end

     0   :  { %s1700_s1 = inlined_call_operand.vmem [shape: bf16[896,128], index: 1, kind: input, shape index: {}]   ;;  %s1701_s0 = inlined_call_operand.vmem [shape: bf16[32,896], index: 0, kind: input, shape index: {}]   ;;  %s1702_s3 = inlined_call_operand.vmem [shape: bf16[128,128], index: 3, kind: input, shape index: {}]   ;;  %s1703_s5 = inlined_call_operand.vmem [shape: bf16[128,128], index: 5, kind: input, shape index: {}]   ;;  %s1704_s2 = inlined_call_operand.vmem [shape: f32[1,128], index: 2, kind: input, shape index: {}]   ;;  %s1705_s4 = inlined_call_operand.vmem [shape: f32[1,128], index: 4, kind: input, shape index: {}]   ;;  %s1706_s6 = inlined_call_operand.vmem [shape: f32[1,128], index: 6, kind: input, shape index: {}]   ;;  %s1707_s7 = inlined_call_operand.vmem [shape: f32[32,128], index: 7, kind: output, shape index: {}]  }
   0x1   :  { %v1289_v0 = vld [vmem:[%s1700_s1 + $0x40] sm:$0xff]   ;;  %v1293_v4 = vld [vmem:[%s1700_s1 + $0x48] sm:$0xff]   ;;  %v1297_v8 = vld [vmem:[%s1700_s1 + $0x50] sm:$0xff]  }
   0x2   :  { %v1290_v1 = vld [vmem:[%s1700_s1] sm:$0xff]   ;;  %1115 = vmatprep.subr.bf16.mxu0 %v1289_v0  ;;  %v1294_v5 = vld [vmem:[%s1700_s1 + $0x8] sm:$0xff]   ;;  %v1298_v9 = vld [vmem:[%s1700_s1 + $0x10] sm:$0xff]  }
   0x3   :  { %v1291_v2 = vld [vmem:[%s1700_s1 + $0xc0] sm:$0xff]   ;;  %1116 = vmatpush3.bf16.msra.mxu0 %v1290_v1  ;;  %v1295_v6 = vld [vmem:[%s1700_s1 + $0xc8] sm:$0xff]   ;;  %v1299_v10 = vld [vmem:[%s1700_s1 + $0xd0] sm:$0xff]  }
   0x4   :  { %v1292_v3 = vld [vmem:[%s1700_s1 + $0x80] sm:$0xff]   ;;  %1143 = vmatprep.subr.bf16.mxu1 %v1291_v2  ;;  %1117 = vmatprep.subr.bf16.mxu0 %v1293_v4  ;;  %v1296_v7 = vld [vmem:[%s1700_s1 + $0x88] sm:$0xff]   ;;  %v1300_v11 = vld [vmem:[%s1700_s1 + $0x90] sm:$0xff]  }
   0x5   :  { %1144 = vmatpush3.bf16.msra.mxu1 %v1292_v3  ;;  %v1301_v12 = vld [vmem:[%s1700_s1 + $0x58] sm:$0xff]   ;;  %v1305_v16 = vld [vmem:[%s1700_s1 + $0x60] sm:$0xff]   ;;  %v1309_v20 = vld [vmem:[%s1700_s1 + $0x68] sm:$0xff]  }
   0x6   :  { %1145 = vmatprep.subr.bf16.mxu1 %v1295_v6  ;;  %v1302_v13 = vld [vmem:[%s1700_s1 + $0x18] sm:$0xff]   ;;  %v1306_v17 = vld [vmem:[%s1700_s1 + $0x20] sm:$0xff]   ;;  %v1310_v21 = vld [vmem:[%s1700_s1 + $0x28] sm:$0xff]  }
   0x7   :  { %1118 = vmatpush3.bf16.msra.mxu0 %v1294_v5  ;;  %v1303_v14 = vld [vmem:[%s1700_s1 + $0xd8] sm:$0xff]   ;;  %v1307_v18 = vld [vmem:[%s1700_s1 + $0xe0] sm:$0xff]   ;;  %v1311_v22 = vld [vmem:[%s1700_s1 + $0xe8] sm:$0xff]  }
   0x8   :  { %1119 = vmatprep.subr.bf16.mxu0 %v1297_v8  ;;  %v1304_v15 = vld [vmem:[%s1700_s1 + $0x98] sm:$0xff]   ;;  %v1308_v19 = vld [vmem:[%s1700_s1 + $0xa0] sm:$0xff]   ;;  %v1312_v23 = vld [vmem:[%s1700_s1 + $0xa8] sm:$0xff]  }
   0x9   :  { %1146 = vmatpush3.bf16.msra.mxu1 %v1296_v7  ;;  %v1313_v24 = vld [vmem:[%s1700_s1 + $0x70] sm:$0xff]   ;;  %v1317_v28 = vld [vmem:[%s1700_s1 + $0x78] sm:$0xff]   ;;  %v1322_v32 = vld [vmem:[%s1701_s0 + $0x4] ss:$28 sps:$4 sm:$0xff]  }
   0xa   :  { %1147 = vmatprep.subr.bf16.mxu1 %v1299_v10  ;;  %v1314_v25 = vld [vmem:[%s1700_s1 + $0x30] sm:$0xff]   ;;  %v1318_v29 = vld [vmem:[%s1700_s1 + $0x38] sm:$0xff]   ;;  %602 = vmatprep.mubr.bf16.mxu0 %v1322_v32  ;;  %v1324_v34 = vld [vmem:[%s1700_s1 + $0x140] sm:$0xff]  }
   0xb   :  { %1120 = vmatpush3.bf16.msra.mxu0 %v1298_v9  ;;  %v1315_v26 = vld [vmem:[%s1700_s1 + $0xf0] sm:$0xff]   ;;  %v1319_v30 = vld [vmem:[%s1700_s1 + $0xf8] sm:$0xff]   ;;  %v1325_v35 = vld [vmem:[%s1701_s0 + $0x8] ss:$28 sps:$4 sm:$0xff]  }
   0xc   :  { %1121 = vmatprep.subr.bf16.mxu0 %v1301_v12  ;;  %v1316_v27 = vld [vmem:[%s1700_s1 + $0xb0] sm:$0xff]   ;;  %v1320_v31 = vld [vmem:[%s1701_s0] ss:$28 sps:$4 sm:$0xff]   ;;  %v1327_v36 = vld [vmem:[%s1701_s0 + $0xc] ss:$28 sps:$4 sm:$0xff]  }
   0xd   :  { %1148 = vmatpush3.bf16.msra.mxu1 %v1300_v11  ;;  %v1323_v33 = vld [vmem:[%s1700_s1 + $0xb8] sm:$0xff]   ;;  %v1328_v37 = vld [vmem:[%s1700_s1 + $0x100] sm:$0xff]   ;;  %651 = vmatprep.mubr.bf16.mxu1 %v1327_v36  ;;  %v1329_v38 = vld [vmem:[%s1700_s1 + $0x148] sm:$0xff]  }
   0xe   :  { %1149 = vmatprep.subr.bf16.mxu1 %v1303_v14  ;;  %v1330_v39 = vld [vmem:[%s1700_s1 + $0x180] sm:$0xff]   ;;  %v1331_v40 = vld [vmem:[%s1700_s1 + $0x108] sm:$0xff]   ;;  %v1332_v41 = vld [vmem:[%s1700_s1 + $0x150] sm:$0xff]  }
   0xf   :  { %1122 = vmatpush3.bf16.msra.mxu0 %v1302_v13  ;;  %v1333_v42 = vld [vmem:[%s1700_s1 + $0x188] sm:$0xff]   ;;  %v1334_v43 = vld [vmem:[%s1700_s1 + $0x110] sm:$0xff]   ;;  %v1335_v44 = vld [vmem:[%s1700_s1 + $0x158] sm:$0xff]  }
  0x10   :  { %1123 = vmatprep.subr.bf16.mxu0 %v1305_v16  ;;  %v1336_v45 = vld [vmem:[%s1700_s1 + $0x190] sm:$0xff]   ;;  %v1337_v46 = vld [vmem:[%s1700_s1 + $0x118] sm:$0xff]   ;;  %v1338_v47 = vld [vmem:[%s1700_s1 + $0x160] sm:$0xff]  }
  0x11   :  { %1150 = vmatpush3.bf16.msra.mxu1 %v1304_v15  ;;  %v1339_v48 = vld [vmem:[%s1700_s1 + $0x198] sm:$0xff]   ;;  %v1340_v49 = vld [vmem:[%s1700_s1 + $0x120] sm:$0xff]   ;;  %v1343_v51 = vld [vmem:[%s1700_s1 + $0x168] sm:$0xff]  }
  0x12   :  { %1151 = vmatprep.subr.bf16.mxu1 %v1307_v18  ;;  %v1341_v50 = vld [vmem:[%s1701_s0 + $0x3c] ss:$28 sps:$4 sm:$0xff]   ;;  %v1344_v52 = vld [vmem:[%s1700_s1 + $0x1a0] sm:$0xff]   ;;  %v1346_v54 = vld [vmem:[%s1700_s1 + $0x128] sm:$0xff]  }
  0x13   :  { %1124 = vmatpush3.bf16.msra.mxu0 %v1306_v17  ;;  %v1345_v53 = vld [vmem:[%s1701_s0 + $0x38] ss:$28 sps:$4 sm:$0xff]   ;;  %v1347_v55 = vld [vmem:[%s1701_s0 + $0x44] ss:$28 sps:$4 sm:$0xff]   ;;  %v1351_v58 = vld [vmem:[%s1700_s1 + $0x1a8] sm:$0xff]  }
  0x14   :  { %1125 = vmatprep.subr.bf16.mxu0 %v1309_v20  ;;  %v1349_v56 = vld [vmem:[%s1701_s0 + $0x40] ss:$28 sps:$4 sm:$0xff]   ;;  %v1350_v57 = vld [vmem:[%s1700_s1 + $0x170] sm:$0xff]   ;;  %v1362_v3 = vld [vmem:[%s1701_s0 + $0x4c] ss:$28 sps:$4 sm:$0xff]  }
  0x15   :  { %1152 = vmatpush3.bf16.msra.mxu1 %v1308_v19  ;;  %v1352_v59 = vld [vmem:[%s1700_s1 + $0x130] sm:$0xff]   ;;  %v1353_v60 = vld [vmem:[%s1700_s1 + $0x178] sm:$0xff]   ;;  %v1364_v5 = vld [vmem:[%s1701_s0 + $0x48] ss:$28 sps:$4 sm:$0xff]  }
  0x16   :  { %1153 = vmatprep.subr.bf16.mxu1 %v1311_v22  ;;  %v1354_v61 = vld [vmem:[%s1700_s1 + $0x1b0] sm:$0xff]   ;;  %v1355_v62 = vld [vmem:[%s1700_s1 + $0x138] sm:$0xff]   ;;  %v1365_v6 = vld [vmem:[%s1702_s3] sm:$0xff]  }
  0x17   :  { %1126 = vmatpush3.bf16.msra.mxu0 %v1310_v21  ;;  %v1358_v63 = vld [vmem:[%s1701_s0 + $0x14] ss:$28 sps:$4 sm:$0xff]   ;;  %v1359_v0 = vld [vmem:[%s1700_s1 + $0x1b8] sm:$0xff]   ;;  %v1366_v7 = vld [vmem:[%s1702_s3 + $0x8] sm:$0xff]  }
  0x18   :  { %1127 = vmatprep.subr.bf16.mxu0 %v1313_v24  ;;  %v1360_v1 = vld [vmem:[%s1701_s0 + $0x18] ss:$28 sps:$4 sm:$0xff]   ;;  %v1356_v2 = vld [vmem:[%s1701_s0 + $0x10] ss:$28 sps:$4 sm:$0xff]   ;;  %v1369_v10 = vld [vmem:[%s1702_s3 + $0x20] sm:$0xff]  }
  0x19   :  { %1154 = vmatpush3.bf16.msra.mxu1 %v1312_v23  ;;  %v1361_v4 = vld [vmem:[%s1701_s0 + $0x50] ss:$28 sps:$4 sm:$0xff]   ;;  %v1368_v9 = vld [vmem:[%s1702_s3 + $0x18] sm:$0xff]   ;;  %v1373_v14 = vld [vmem:[%s1703_s5] sm:$0xff]  }
  0x1a   :  { %1155 = vmatprep.subr.bf16.mxu1 %v1315_v26  ;;  %v1367_v8 = vld [vmem:[%s1702_s3 + $0x10] sm:$0xff]   ;;  %v1370_v11 = vld [vmem:[%s1702_s3 + $0x28] sm:$0xff]   ;;  %v1372_v13 = vld [vmem:[%s1702_s3 + $0x38] sm:$0xff]  }
  0x1b   :  { %1128 = vmatpush3.bf16.msra.mxu0 %v1314_v25  ;;  %v1371_v12 = vld [vmem:[%s1702_s3 + $0x30] sm:$0xff]   ;;  %v1374_v15 = vld [vmem:[%s1703_s5 + $0x8] sm:$0xff]   ;;  %v1376_v17 = vld [vmem:[%s1703_s5 + $0x18] sm:$0xff]  }
  0x1c   :  { %1129 = vmatprep.subr.bf16.mxu0 %v1317_v28  ;;  %v1375_v16 = vld [vmem:[%s1703_s5 + $0x10] sm:$0xff]   ;;  %v1377_v18 = vld [vmem:[%s1703_s5 + $0x20] sm:$0xff]   ;;  %v1378_v19 = vld [vmem:[%s1703_s5 + $0x28] sm:$0xff]  }
  0x1d   :  { %1156 = vmatpush3.bf16.msra.mxu1 %v1316_v27  ;;  %v1026_v21 = vld [vmem:[%s1704_s2] ss:$0 sm:$0xff] }
  0x1e   :  { %1157 = vmatprep.subr.bf16.mxu1 %v1319_v30 }
  0x1f   :  { %1130 = vmatpush3.bf16.msra.mxu0 %v1318_v29 }
  0x20   :  { %1171 = vmatprep.subr.bf16.mxu0 %v1324_v34 }
  0x21   :  { %1158 = vmatpush3.bf16.msra.mxu1 %v1323_v33 }
  0x22   :  { %603 = vmatmul.mubr.bf16.vlgmr.msra.gmra.mrb[0].mxu0 %v1320_v31  ;;  %1229 = vmatprep.subr.bf16.mxu1 %v1330_v39 }
  0x23   :  { %1172 = vmatpush3.bf16.msra.mxu0 %v1328_v37  ;;  %610 = vmatprep.mubr.bf16.mxu0 %v1341_v50 }
  0x24   :  { %652 = vmatmul.mubr.bf16.vlgmr.msra.gmra.mrb[0].mxu1 %v1325_v35  ;;  %1173 = vmatprep.subr.bf16.mxu0 %v1329_v38 }
  0x25   :  { %1230 = vmatpush3.bf16.msra.mxu1 %v1330_v39  ;;  %659 = vmatprep.mubr.bf16.mxu1 %v1347_v55 }
  0x26   :  { %1231 = vmatprep.subr.bf16.mxu1 %v1333_v42 }
  0x27   :  { %1174 = vmatpush3.bf16.msra.mxu0 %v1331_v40 }
  0x28   :  { %1175 = vmatprep.subr.bf16.mxu0 %v1332_v41 }
  0x29   :  { %1232 = vmatpush3.bf16.msra.mxu1 %v1333_v42 }
  0x2a   :  { %1233 = vmatprep.subr.bf16.mxu1 %v1336_v45  ;;  %611 = vmatmul.mubr.bf16.gmra.mrb[4].mxu0 %v1345_v53 }
  0x2b   :  { %1176 = vmatpush3.bf16.msra.mxu0 %v1334_v43  ;;  %700 = vmatprep.mubr.bf16.mxu0 %v1358_v63 }
  0x2c   :  { %1177 = vmatprep.subr.bf16.mxu0 %v1335_v44  ;;  %660 = vmatmul.mubr.bf16.gmra.mrb[4].mxu1 %v1349_v56 }
  0x2d   :  { %1234 = vmatpush3.bf16.msra.mxu1 %v1336_v45  ;;  %1245 = vmatprep.mubr.bf16.mxu1 %v1360_v1 }
  0x2e   :  { %1235 = vmatprep.subr.bf16.mxu1 %v1339_v48 }
  0x2f   :  { %1178 = vmatpush3.bf16.msra.mxu0 %v1337_v46 }
  0x30   :  { %1179 = vmatprep.subr.bf16.mxu0 %v1338_v47 }
  0x31   :  { %1236 = vmatpush3.bf16.msra.mxu1 %v1339_v48 }
  0x32   :  { %1237 = vmatprep.subr.bf16.mxu1 %v1344_v52 }
  0x33   :  { %1180 = vmatpush3.bf16.msra.mxu0 %v1340_v49 }
  0x34   :  { %1181 = vmatprep.subr.bf16.mxu0 %v1343_v51 }
  0x35   :  { %1238 = vmatpush3.bf16.msra.mxu1 %v1344_v52 }
  0x36   :  { %1239 = vmatprep.subr.bf16.mxu1 %v1351_v58 }
  0x37   :  { %1182 = vmatpush3.bf16.msra.mxu0 %v1346_v54 }
  0x38   :  { %1183 = vmatprep.subr.bf16.mxu0 %v1350_v57 }
  0x39   :  { %1240 = vmatpush3.bf16.msra.mxu1 %v1351_v58 }
  0x3a   :  { %1241 = vmatprep.subr.bf16.mxu1 %v1354_v61 }
  0x3b   :  { %1184 = vmatpush3.bf16.msra.mxu0 %v1352_v59 }
  0x3c   :  { %1185 = vmatprep.subr.bf16.mxu0 %v1353_v60 }
  0x3d   :  { %1242 = vmatpush3.bf16.msra.mxu1 %v1354_v61 }
  0x3e   :  { %1243 = vmatprep.subr.bf16.mxu1 %v1359_v0 }
  0x3f   :  { %1186 = vmatpush3.bf16.msra.mxu0 %v1355_v62 }
  0x40   :  { %1249 = vmatprep.subr.bf16.mxu0 %v1365_v6 }
  0x41   :  { %1244 = vmatpush3.bf16.msra.mxu1 %v1359_v0 }
  0x42   :  { %701 = vmatmul.mubr.bf16.vlgmr.msra.gmra.mrb[8].mxu0 %v1356_v2  ;;  %1269 = vmatprep.subr.bf16.mxu1 %v1373_v14 }
  0x43   :  { %708 = vmatprep.mubr.bf16.mxu0 %v1362_v3  ;;  %1250 = vmatpush3.bf16.msra.mxu0 %v1365_v6 }
  0x44   :  { %1246 = vmatmul.mubr.bf16.vlgmr.msra.gmra.mrb[8].mxu1 %v1361_v4  ;;  %1251 = vmatprep.subr.bf16.mxu0 %v1366_v7 }
  0x45   :  { %1270 = vmatpush3.bf16.msra.mxu1 %v1373_v14 }
  0x46   :  { %1271 = vmatprep.subr.bf16.mxu1 %v1374_v15 }
  0x47   :  { %1252 = vmatpush3.bf16.msra.mxu0 %v1366_v7 }
  0x48   :  { %1253 = vmatprep.subr.bf16.mxu0 %v1367_v8 }
  0x49   :  { %1272 = vmatpush3.bf16.msra.mxu1 %v1374_v15 }
  0x4a   :  { %709 = vmatmul.mubr.bf16.gmra.mrb[12].mxu0 %v1364_v5  ;;  %1273 = vmatprep.subr.bf16.mxu1 %v1375_v16 }
  0x4b   :  { %1254 = vmatpush3.bf16.msra.mxu0 %v1367_v8 }
  0x4c   :  { %1255 = vmatprep.subr.bf16.mxu0 %v1368_v9 }
  0x4d   :  { %1274 = vmatpush3.bf16.msra.mxu1 %v1375_v16 }
  0x4e   :  { %1275 = vmatprep.subr.bf16.mxu1 %v1376_v17 }
  0x4f   :  { %1256 = vmatpush3.bf16.msra.mxu0 %v1368_v9 }
  0x50   :  { %1257 = vmatprep.subr.bf16.mxu0 %v1369_v10 }
  0x51   :  { %1276 = vmatpush3.bf16.msra.mxu1 %v1376_v17 }
  0x52   :  { %1277 = vmatprep.subr.bf16.mxu1 %v1377_v18 }
  0x53   :  { %1258 = vmatpush3.bf16.msra.mxu0 %v1369_v10 }
  0x54   :  { %1259 = vmatprep.subr.bf16.mxu0 %v1370_v11 }
  0x55   :  { %1278 = vmatpush3.bf16.msra.mxu1 %v1377_v18 }
  0x56   :  { %1279 = vmatprep.subr.bf16.mxu1 %v1378_v19 }
  0x57   :  { %1260 = vmatpush3.bf16.msra.mxu0 %v1370_v11 }
  0x58   :  { %1261 = vmatprep.subr.bf16.mxu0 %v1371_v12 }
  0x59   :  { %1280 = vmatpush3.bf16.msra.mxu1 %v1378_v19  ;;  %v1379_v19 = vld [vmem:[%s1703_s5 + $0x30] sm:$0xff]  }
  0x5a   :  { %1281 = vmatprep.subr.bf16.mxu1 %v1379_v19 }
  0x5b   :  { %1262 = vmatpush3.bf16.msra.mxu0 %v1371_v12 }
  0x5c   :  { %1263 = vmatprep.subr.bf16.mxu0 %v1372_v13 }
  0x5d   :  { %1282 = vmatpush3.bf16.msra.mxu1 %v1379_v19 }
  0x5f   :  { %1264 = vmatpush3.bf16.msra.mxu0 %v1372_v13 }
  0xf5   :  { %v1131_v20 = vpop.f32.mrb[0].mxu0 }
  0xf6   :  { %v1132_v22 = vpop.f32.mrb[1].mxu0 }
  0xf7   :  { %v1133_v23 = vadd.f32 %v1132_v22, %v1131_v20  ;;  %v1134_v24 = vpop.f32.mrb[2].mxu0  ;;  %v1159_v25 = vpop.f32.mrb[0].mxu1  ;;  %v1380_v20 = vld [vmem:[%s1703_s5 + $0x38] sm:$0xff]  }
  0xf8   :  { %v1135_v26 = vpop.f32.mrb[3].mxu0  ;;  %v1160_v29 = vpop.f32.mrb[1].mxu1  ;;  %1283 = vmatprep.subr.bf16.mxu1 %v1380_v20 }
  0xf9   :  { %v605_v27 = vadd.f32 %v1133_v23, %v1026_v21  ;;  %v1136_v28 = vadd.f32 %v1135_v26, %v1134_v24  ;;  %v1161_v30 = vadd.f32 %v1160_v29, %v1159_v25  ;;  %v1162_v31 = vpop.f32.mrb[2].mxu1  ;;  %1284 = vmatpush3.bf16.msra.mxu1 %v1380_v20 }
  0xfa   :  { %v1163_v33 = vpop.f32.mrb[3].mxu1 }
  0xfb   :  { %v608_v32 = vadd.f32 %v1136_v28, %v1026_v21  ;;  %v654_v34 = vadd.f32 %v1161_v30, %v605_v27  ;;  %v1164_v35 = vadd.f32 %v1163_v33, %v1162_v31 }
  0xfd   :  { %v657_v36 = vadd.f32 %v1164_v35, %v608_v32  ;;  %v1137_v37 = vpop.f32.mrb[4].mxu0 }
  0xfe   :  { %v1138_v38 = vpop.f32.mrb[5].mxu0 }
  0xff   :  { %v1139_v39 = vadd.f32 %v1138_v38, %v1137_v37  ;;  %v1140_v40 = vpop.f32.mrb[6].mxu0  ;;  %v1165_v41 = vpop.f32.mrb[4].mxu1 }
 0x100   :  { %v1141_v42 = vpop.f32.mrb[7].mxu0  ;;  %v1166_v45 = vpop.f32.mrb[5].mxu1 }
 0x101   :  { %v613_v43 = vadd.f32 %v1139_v39, %v1026_v21  ;;  %v1142_v44 = vadd.f32 %v1141_v42, %v1140_v40  ;;  %v1167_v46 = vadd.f32 %v1166_v45, %v1165_v41  ;;  %v1168_v47 = vpop.f32.mrb[6].mxu1 }
 0x102   :  { %v1169_v49 = vpop.f32.mrb[7].mxu1 }
 0x103   :  { %v616_v48 = vadd.f32 %v1142_v44, %v1026_v21  ;;  %v662_v50 = vadd.f32 %v1167_v46, %v613_v43  ;;  %v1170_v51 = vadd.f32 %v1169_v49, %v1168_v47  ;;  %v1097_v21 = vld [vmem:[%s1705_s4] ss:$0 sm:$0xff] }
 0x105   :  { %v665_v52 = vadd.f32 %v1170_v51, %v616_v48 }
 0x115   :  { %v1187_v53 = vpop.f32.mrb[8].mxu0 }
 0x116   :  { %v1188_v54 = vpop.f32.mrb[9].mxu0 }
 0x117   :  { %v1189_v55 = vadd.f32 %v1188_v54, %v1187_v53  ;;  %v1190_v56 = vpop.f32.mrb[10].mxu0  ;;  %v1247_v58 = vpop.f32.mrb[8].mxu1 }
 0x118   :  { %v1191_v57 = vpop.f32.mrb[11].mxu0  ;;  %v751_v61 = vpop.f32.mrb[9].mxu1 }
 0x119   :  { %v1192_v59 = vadd.f32 %v1191_v57, %v1190_v56  ;;  %v703_v60 = vadd.f32 %v1189_v55, %v654_v34  ;;  %v1248_v62 = vpop.f32.mrb[10].mxu1 }
 0x11a   :  { %v754_v1 = vpop.f32.mrb[11].mxu1 }
 0x11b   :  { %v752_v63 = vadd.f32 %v751_v61, %v703_v60  ;;  %v706_v0 = vadd.f32 %v1192_v59, %v657_v36  ;;  %v1106_v36 = vld [vmem:[%s1706_s6] ss:$0 sm:$0xff] }
 0x11d   :  { %v755_v2 = vadd.f32 %v754_v1, %v706_v0  ;;  %v1193_v3 = vpop.f32.mrb[12].mxu0  ;;  %v766_v5 = vmax.f32 %v752_v63, 0.0 }
 0x11e   :  { %v1194_v4 = vpop.f32.mrb[13].mxu0 }
 0x11f   :  { %v767_v6 = vmax.f32 %v755_v2, 0.0  ;;  %v1195_v7 = vadd.f32 %v1194_v4, %v1193_v3  ;;  %v1196_v8 = vpop.f32.mrb[14].mxu0 }
 0x120   :  { %v1197_v9 = vpop.f32.mrb[15].mxu0 }
 0x121   :  { %v770_v10 = vpack.c.bf16 %v767_v6, %v766_v5  ;;  %v711_v11 = vadd.f32 %v1195_v7, %v662_v50  ;;  %v1198_v12 = vadd.f32 %v1197_v9, %v1196_v8 }
 0x123   :  { %v760_v13 = vadd.f32 %v1247_v58, %v711_v11  ;;  %v714_v14 = vadd.f32 %v1198_v12, %v665_v52  ;;  %1265 = vmatprep.mubr.bf16.mxu0 %v770_v10 }
 0x125   :  { %v763_v15 = vadd.f32 %v1248_v62, %v714_v14  ;;  %v768_v16 = vmax.f32 %v760_v13, 0.0 }
 0x127   :  { %v769_v17 = vmax.f32 %v763_v15, 0.0 }
 0x129   :  { %v771_v18 = vpack.c.bf16 %v769_v17, %v768_v16 }
 0x12b   :  { %1266 = vmatmul.mubr.bf16.vlgmr.msra.gmra.mrb[16].mxu0 %v771_v18 }
 0x1fe   :  { %v1267_v22 = vpop.f32.mrb[16].mxu0 }
 0x1ff   :  { %v886_v23 = vadd.f32 %v1267_v22, %v1097_v21  ;;  %v877_v24 = vpop.f32.mrb[17].mxu0 }
 0x200   :  { %v878_v25 = vadd.f32 %v1097_v21, %v877_v24  ;;  %v1268_v26 = vpop.f32.mrb[18].mxu0 }
 0x201   :  { %v889_v27 = vadd.f32 %v1268_v26, %v1097_v21  ;;  %v880_v28 = vpop.f32.mrb[19].mxu0  ;;  %v894_v30 = vmax.f32 %v886_v23, 0.0 }
 0x202   :  { %v881_v29 = vadd.f32 %v1097_v21, %v880_v28  ;;  %v892_v32 = vmax.f32 %v878_v25, 0.0 }
 0x203   :  { %v895_v31 = vmax.f32 %v889_v27, 0.0 }
 0x204   :  { %v893_v33 = vmax.f32 %v881_v29, 0.0 }
 0x205   :  { %v897_v34 = vpack.c.bf16 %v895_v31, %v894_v30 }
 0x206   :  { %v896_v35 = vpack.c.bf16 %v893_v33, %v892_v32 }
 0x208   :  { %1285 = vmatprep.mubr.bf16.mxu1 %v896_v35 }
 0x209   :  { %1286 = vmatmul.mubr.bf16.vlgmr.msra.gmra.mrb[12].mxu1 %v897_v34 }
 0x2dc   :  { %v1287_v37 = vpop.f32.mrb[12].mxu1 }
 0x2dd   :  { %v1012_v38 = vadd.f32 %v1287_v37, %v1106_v36  ;;  %v1003_v39 = vpop.f32.mrb[13].mxu1 }
 0x2de   :  { %v1004_v40 = vadd.f32 %v1106_v36, %v1003_v39  ;;  %v1288_v41 = vpop.f32.mrb[14].mxu1 }
 0x2df   :  { %1020 = vst [vmem:[%s1707_s7 + $0x10] sm:$0xff] %v1012_v38  ;;  %v1015_v42 = vadd.f32 %v1288_v41, %v1106_v36  ;;  %v1006_v43 = vpop.f32.mrb[15].mxu1 }
 0x2e0   :  { %1018 = vst [vmem:[%s1707_s7] sm:$0xff] %v1004_v40  ;;  %v1007_v44 = vadd.f32 %v1106_v36, %v1006_v43 }
 0x2e1   :  { %1021 = vst [vmem:[%s1707_s7 + $0x18] sm:$0xff] %v1015_v42 }
 0x2e2   :  { %1019 = vst [vmem:[%s1707_s7 + $0x8] sm:$0xff] %v1007_v44 }

</bundles_post_ra>
